<compile_context>
chip_gen: v5e
topology: v5e:2x2
jax: 0.10.0
libtpu: 0.0.40
codegen_flags: <defaults>
</compile_context>

<pallas_src>
import functools
from typing import NamedTuple, Optional

import jax
import jax.numpy as jnp
from jax.experimental import pallas as pl
from jax.experimental.pallas import tpu as pltpu


# ----------------------------- kernel body ---------------------------------


def _linear_kernel(x_ref, w_ref, o_ref, acc_ref):
    """One (tm, tn) output tile, accumulated over the K grid axis (axis 2)."""

    @pl.when(pl.program_id(2) == 0)
    def _():
        acc_ref[...] = jnp.zeros_like(acc_ref)

    # x_ref: (tm, tk), w_ref: (tk, tn)  -- standard MXU-friendly layout; the
    # weight was transposed/cast/padded ONCE at prepare time, not per call.
    acc_ref[...] += jnp.dot(
        x_ref[...], w_ref[...], preferred_element_type=jnp.float32
    )

    @pl.when(pl.program_id(2) == pl.num_programs(2) - 1)
    def _():
        # Single cast, store-side only.
        o_ref[...] = acc_ref[...].astype(o_ref.dtype)


# --------------------------- tiling utilities -------------------------------


def _round_up(v, m):
    return ((v + m - 1) // m) * m


def _sublane_align(itemsize):
    # Sublane packing: f32 -> 8, bf16/f16 -> 16, int8/fp8 -> 32.
    if itemsize >= 4:
        return 8
    if itemsize == 2:
        return 16
    return 32


def _nk_tiles(N, K, itemsize, tn=None, tk=None):
    """Lane-dim tiles for the weight (chosen once; weight is padded to these)."""
    if tn is None:
        tn = min(1024 if itemsize <= 2 else 512, _round_up(N, 128))
    if tk is None:
        tk = min(512, _round_up(K, 128))
    assert tn % 128 == 0 and tk % 128 == 0, "tn/tk must be 128-aligned"
    return tn, tk


def _m_tile(M, itemsize, tm=None):
    align = _sublane_align(itemsize)
    if tm is None:
        tm = min(512 if itemsize <= 2 else 256, _round_up(M, align))
    assert tm % align == 0, f"tm must be a multiple of {align} for this dtype"
    return tm


def _vmem_capacity_bytes():
    try:
        return int(pltpu.get_tpu_info().vmem_capacity_bytes)
    except Exception:
        return 64 * 1024 * 1024  # conservative (v7x per-TC) fallback


# ------------------------ one-time weight preparation ------------------------


class PreparedExpertWeight(NamedTuple):
    w_kn: jax.Array      # (Kp, Np) transposed / cast / padded weight
    out_features: int
    in_features: int
    tn: int
    tk: int


def prepare_expert_weight(weight, *, compute_dtype: Optional[jnp.dtype] = None,
                          tn=None, tk=None) -> PreparedExpertWeight:
    """Hoisted out of the per-call path: transpose + cast + pad ONCE.

    `weight` is the PyTorch-layout (out_features, in_features) parameter.
    Cache the returned value alongside the module parameters.
    """
    out_features, in_features = weight.shape
    if compute_dtype is not None:
        weight = weight.astype(compute_dtype)
    itemsize = jnp.dtype(weight.dtype).itemsize

    tn, tk = _nk_tiles(out_features, in_features, itemsize, tn, tk)

    w_kn = weight.T  # (K, N) -- standard RHS layout; one-time transpose.
    Kp, Np = _round_up(in_features, tk), _round_up(out_features, tn)
    if (Kp, Np) != (in_features, out_features):
        w_kn = jnp.pad(w_kn, ((0, Kp - in_features), (0, Np - out_features)))
    return PreparedExpertWeight(w_kn, out_features, in_features, tn, tk)


# ------------------------------ forward pass ---------------------------------


def clmoe_expert_forward(x, weight, *, tm=None, compute_dtype=None):
    """y = x @ weight.T (no bias).

    `weight` may be a PreparedExpertWeight (preferred; prepared once at init)
    or a raw (out_features, in_features) array (prepared on the fly - only for
    convenience / small tests).
    """
    if not isinstance(weight, PreparedExpertWeight):
        weight = prepare_expert_weight(weight, compute_dtype=compute_dtype)
    prep = weight

    out_features, in_features = prep.out_features, prep.in_features
    orig_shape = x.shape
    assert orig_shape[-1] == in_features

    out_dtype = x.dtype
    # Cast x ONCE in the wrapper (not per tile) to the streaming dtype.
    if compute_dtype is not None and x.dtype != compute_dtype:
        x = x.astype(compute_dtype)

    x2d = x.reshape(-1, in_features)
    M, K = x2d.shape
    N = out_features
    tn, tk = prep.tn, prep.tk

    x_bytes = jnp.dtype(x2d.dtype).itemsize
    w_bytes = jnp.dtype(prep.w_kn.dtype).itemsize
    o_bytes = jnp.dtype(out_dtype).itemsize

    tm = _m_tile(M, x_bytes, tm)

    Kp, Np = prep.w_kn.shape
    Mp = _round_up(M, tm)
    if (Mp, Kp) != (M, K):
        x2d = jnp.pad(x2d, ((0, Mp - M), (0, Kp - K)))

    grid_n, grid_m, grid_k = Np // tn, Mp // tm, Kp // tk
    # N-tile axis first so that on v7x the two TensorCores get disjoint weight
    # halves (weight >> activations for MoE experts); k innermost (reduction).
    grid = (grid_n, grid_m, grid_k)

    # --- VMEM budget: double-buffered in/out tiles + f32 accumulator. ---
    footprint = (2 * tm * tk * x_bytes
                 + 2 * tk * tn * w_bytes
                 + 2 * tm * tn * o_bytes
                 + tm * tn * 4)
    vmem_cap = _vmem_capacity_bytes()
    vmem_limit = min(max(int(footprint * 2), 16 * 1024 * 1024),
                     int(vmem_cap * 0.8))

    # Real HBM traffic: x re-streamed once per N-tile, weight once per M-tile.
    cost = pl.CostEstimate(
        flops=2 * Mp * Np * Kp,
        transcendentals=0,
        bytes_accessed=(Mp * Kp * x_bytes * grid_n
                        + Np * Kp * w_bytes * grid_m
                        + Mp * Np * o_bytes),
    )

    out2d = pl.pallas_call(
        _linear_kernel,
        out_shape=jax.ShapeDtypeStruct((Mp, Np), out_dtype),
        grid_spec=pltpu.PrefetchScalarGridSpec(
            num_scalar_prefetch=0,
            grid=grid,
            in_specs=[
                pl.BlockSpec((tm, tk), lambda j, i, k: (i, k)),   # x
                pl.BlockSpec((tk, tn), lambda j, i, k: (k, j)),   # w (K, N)
            ],
            out_specs=pl.BlockSpec((tm, tn), lambda j, i, k: (i, j)),
            scratch_shapes=[pltpu.VMEM((tm, tn), jnp.float32)],
        ),
        compiler_params=pltpu.CompilerParams(
            dimension_semantics=("parallel", "parallel", "arbitrary"),
            vmem_limit_bytes=vmem_limit,
        ),
        cost_estimate=cost,
    )(x2d, prep.w_kn)

    # Strip padding and restore leading dims.
    out2d = out2d[:M, :N]
    return out2d.reshape(*orig_shape[:-1], out_features)


# --------------------------------- demo --------------------------------------


if __name__ == "__main__":
    # Small shapes consistent with the module: batch=2, seq=8, hidden(in)=32, out=64.
    in_features = 32
    out_features = 64
    batch, seq = 2, 8

    key = jax.random.PRNGKey(0)
    kx, kw = jax.random.split(key)

    x = jax.random.normal(kx, (batch, seq, in_features), dtype=jnp.float32)
    # Deterministic init matching nn.Linear's weight shape (out_features, in_features).
    bound = 1.0 / (in_features ** 0.5)
    weight = jax.random.uniform(
        kw, (out_features, in_features), dtype=jnp.float32,
        minval=-bound, maxval=bound)

    # One-time (cached) weight preparation -- f32 here so the reference check is
    # bit-tight.  On v6e/v7x pass compute_dtype=jnp.bfloat16 to both
    # prepare_expert_weight and clmoe_expert_forward for MXU peak (use a looser
    # tolerance, e.g. atol/rtol ~2e-2, for the bf16 path).
    prepared = prepare_expert_weight(weight, compute_dtype=None)

    y = clmoe_expert_forward(x, prepared)
    y = jax.block_until_ready(y)

    # Sanity check against plain JAX reference.
    y_ref = x @ weight.T
    assert y.shape == (batch, seq, out_features)
    assert jnp.allclose(y, y_ref, atol=1e-5, rtol=1e-5)

    print("KERNEL_OK")
</pallas_src>

<mosaic_0001>
module attributes {stable_mosaic.version = 11 : i64} {
  func.func @_linear_kernel(%arg0: i32, %arg1: i32, %arg2: i32, %arg3: memref<16x128xf32, #tpu.memory_space<vmem>>, %arg4: memref<128x128xf32, #tpu.memory_space<vmem>>, %arg5: memref<16x128xf32, #tpu.memory_space<vmem>>, %arg6: memref<16x128xf32, #tpu.memory_space<vmem>>) attributes {dimension_semantics = [#tpu.dimension_semantics<parallel>, #tpu.dimension_semantics<parallel>, #tpu.dimension_semantics<arbitrary>], iteration_bounds = array<i64: 1, 1, 1>, scalar_prefetch = 0 : i64, scratch_operands = 1 : i64, tpu.core_type = #tpu.core_type<tc>, window_params = [{transform_indices = @transform_0, window_bounds = array<i64: 16, 128>}, {transform_indices = @transform_1, window_bounds = array<i64: 128, 128>}, {transform_indices = @transform_2, window_bounds = array<i64: 16, 128>}]} {
    %c0_i32 = arith.constant 0 : i32
    %0 = arith.cmpi eq, %arg2, %c0_i32 : i32
    %1 = arith.extui %0 : i1 to i32
    %c0_i32_0 = arith.constant 0 : i32
    %2 = arith.cmpi ne, %1, %c0_i32_0 : i32
    scf.if %2 {
      %cst_10 = arith.constant 0.000000e+00 : f32
      %12 = vector.broadcast %cst_10 : f32 to vector<16x128xf32>
      %c0_11 = arith.constant 0 : index
      %c0_12 = arith.constant 0 : index
      %13 = vector.load %arg6[%c0_11, %c0_12] : memref<16x128xf32, #tpu.memory_space<vmem>>, vector<16x128xf32>
      tpu.vector_store %arg6[%c0_11, %c0_12], %12 {strides = array<i32>} : memref<16x128xf32, #tpu.memory_space<vmem>>, vector<16x128xf32>,
    } else {
    }
    %c0 = arith.constant 0 : index
    %c0_1 = arith.constant 0 : index
    %3 = vector.load %arg6[%c0, %c0_1] : memref<16x128xf32, #tpu.memory_space<vmem>>, vector<16x128xf32>
    %c0_2 = arith.constant 0 : index
    %c0_3 = arith.constant 0 : index
    %4 = vector.load %arg3[%c0_2, %c0_3] : memref<16x128xf32, #tpu.memory_space<vmem>>, vector<16x128xf32>
    %c0_4 = arith.constant 0 : index
    %c0_5 = arith.constant 0 : index
    %5 = vector.load %arg4[%c0_4, %c0_5] : memref<128x128xf32, #tpu.memory_space<vmem>>, vector<128x128xf32>
    %cst = arith.constant dense<0.000000e+00> : vector<16x128xf32>
    %6 = tpu.matmul %4, %5, %cst {dimension_numbers = #tpu.dot_dimension_numbers<[1], [0], [0], [1], [0, 0, 1, 1], [], []>} : vector<16x128xf32>, vector<128x128xf32>, vector<16x128xf32> -> vector<16x128xf32>
    %7 = arith.addf %3, %6 : vector<16x128xf32>
    %c0_6 = arith.constant 0 : index
    %c0_7 = arith.constant 0 : index
    %8 = vector.load %arg6[%c0_6, %c0_7] : memref<16x128xf32, #tpu.memory_space<vmem>>, vector<16x128xf32>
    tpu.vector_store %arg6[%c0_6, %c0_7], %7 {strides = array<i32>} : memref<16x128xf32, #tpu.memory_space<vmem>>, vector<16x128xf32>,
    %c0_i32_8 = arith.constant 0 : i32
    %9 = arith.cmpi eq, %arg2, %c0_i32_8 : i32
    %10 = arith.extui %9 : i1 to i32
    %c0_i32_9 = arith.constant 0 : i32
    %11 = arith.cmpi ne, %10, %c0_i32_9 : i32
    scf.if %11 {
      %c0_10 = arith.constant 0 : index
      %c0_11 = arith.constant 0 : index
      %12 = vector.load %arg6[%c0_10, %c0_11] : memref<16x128xf32, #tpu.memory_space<vmem>>, vector<16x128xf32>
      %c0_12 = arith.constant 0 : index
      %c0_13 = arith.constant 0 : index
      %13 = vector.load %arg5[%c0_12, %c0_13] : memref<16x128xf32, #tpu.memory_space<vmem>>, vector<16x128xf32>
      tpu.vector_store %arg5[%c0_12, %c0_13], %12 {strides = array<i32>} : memref<16x128xf32, #tpu.memory_space<vmem>>, vector<16x128xf32>,
    } else {
    }
    return
  }
  func.func @transform_0(%arg0: i32, %arg1: i32, %arg2: i32) -> (i32, i32) {
    %c0_i32 = arith.constant 0 : i32
    return %arg1, %arg2 : i32, i32
  }
  func.func @transform_1(%arg0: i32, %arg1: i32, %arg2: i32) -> (i32, i32) {
    %c0_i32 = arith.constant 0 : i32
    return %arg2, %arg0 : i32, i32
  }
  func.func @transform_2(%arg0: i32, %arg1: i32, %arg2: i32) -> (i32, i32) {
    %c0_i32 = arith.constant 0 : i32
    return %arg1, %arg0 : i32, i32
  }
}

</mosaic_0001>

<bundles_post_ra>
// kernel: tpu_custom_call.1
= control target key start
LH: loop header
LB: loop body
LE: loop exit
PB: predicated region body
PF: predicated region fallthrough
CT: control target
= control target key end

     0   :  { %7 = vsyncpa [#allocation4], 0  ;;  %s261_s0 = inlined_call_operand.hbm [shape: f32[16,128], index: 0, kind: input, shape index: {}]   ;;  %s262_s1 = inlined_call_operand.hbm [shape: f32[128,128], index: 1, kind: input, shape index: {}]   ;;  %s263_s2 = inlined_call_operand.hbm [shape: f32[16,128], index: 2, kind: output, shape index: {}]  }
   0x1   :  { %8 = vsyncpa [#allocation7], 0 }
   0x2   :  { %9 = vsyncpa [#allocation5], 0  ;;  %s14_s11 = sshll.u32 %s261_s0, 4  ;;  %s223_s12 = smov [#allocation3]   ;;  %s15_s11 = int_to_ptr.hbm [resolvable:$true] %s14_s11 }
   0x3   :  { %s16_s13 = sshll.u32 %s223_s12, 4  ;;  %s27_s16 = sshll.u32 %s262_s1, 4  ;;  %s17_s13 = int_to_ptr.vmem [resolvable:$true] %s16_s13  ;;  %s28_s16 = int_to_ptr.hbm [resolvable:$true] %s27_s16 }
   0x4   :  { %s224_s17 = smov 128   ;;  %s225_s18 = smov 8  }
   0x5   :  { %22 = dma.hbm_to_vmem [thread:$0]  %s15_s11, 256, %s17_s13, [#allocation4], %s224_s17, %s224_s17, %s225_s18  }
   0x6   :  { %s226_s19 = smov [#allocation6]  }
   0x7   :  { %s29_s20 = sshll.u32 %s226_s19, 4  ;;  %s30_s20 = int_to_ptr.vmem [resolvable:$true] %s29_s20 }
   0x8   :  { %35 = dma.hbm_to_vmem [thread:$0]  %s28_s16, 2048, %s30_s20, [#allocation7], %s224_s17, %s224_s17, %s225_s18  }
   0x9   :  { %217 = dma.done.wait [#allocation4], 256  }
   0xa   :  { %218 = vsyncadd [#allocation4], 4294967040 }
   0xb   :  { %219 = dma.done.wait [#allocation7], 2048  }
   0xc   :  { %220 = vsyncadd [#allocation7], 4294965248  ;;  %v69_v0 = vld [vmem:[#allocation6 + $0x78] sm:$0xff]  ;;  %v68_v1 = vld [vmem:[#allocation6 + $0x70] sm:$0xff]  ;;  %s227_s0 = smov [#allocation8]   ;;  %s110_s23 = sshll.u32 %s263_s2, 4  ;;  %s111_s23 = int_to_ptr.hbm [resolvable:$true] %s110_s23 }
   0xd   :  { %70 = vmatpush.msra.mxu0 %v69_v0  ;;  %124 = vmatpush.msra.mxu1 %v69_v0  ;;  %v67_v2 = vld [vmem:[#allocation6 + $0x68] sm:$0xff]  ;;  %v66_v3 = vld [vmem:[#allocation6 + $0x60] sm:$0xff]  ;;  %v65_v4 = vld [vmem:[#allocation6 + $0x58] sm:$0xff]  ;;  %s108_s1 = sshll.u32 %s227_s0, 4  ;;  %s109_s1 = int_to_ptr.vmem [resolvable:$true] %s108_s1 }
   0xe   :  { %v64_v5 = vld [vmem:[#allocation6 + $0x50] sm:$0xff]  ;;  %v63_v6 = vld [vmem:[#allocation6 + $0x48] sm:$0xff]  ;;  %v62_v7 = vld [vmem:[#allocation6 + $0x40] sm:$0xff] }
   0xf   :  { %71 = vmatpush.msra.mxu0 %v68_v1  ;;  %125 = vmatpush.msra.mxu1 %v68_v1  ;;  %v61_v8 = vld [vmem:[#allocation6 + $0x38] sm:$0xff]  ;;  %v60_v9 = vld [vmem:[#allocation6 + $0x30] sm:$0xff]  ;;  %v59_v10 = vld [vmem:[#allocation6 + $0x28] sm:$0xff] }
  0x10   :  { %v58_v11 = vld [vmem:[#allocation6 + $0x20] sm:$0xff]  ;;  %v57_v12 = vld [vmem:[#allocation6 + $0x18] sm:$0xff]  ;;  %v56_v13 = vld [vmem:[#allocation6 + $0x10] sm:$0xff] }
  0x11   :  { %72 = vmatpush.msra.mxu0 %v67_v2  ;;  %126 = vmatpush.msra.mxu1 %v67_v2  ;;  %v55_v14 = vld [vmem:[#allocation6 + $0x8] sm:$0xff]  ;;  %v54_v15 = vld [vmem:[#allocation6] sm:$0xff]  ;;  %v52_v16 = vld [vmem:[#allocation3] sm:$0xff] }
  0x12   :  { %v53_v17 = vld [vmem:[#allocation3 + $0x8] sm:$0xff] }
  0x13   :  { %73 = vmatpush.msra.mxu0 %v66_v3  ;;  %127 = vmatpush.msra.mxu1 %v66_v3 }
  0x15   :  { %74 = vmatpush.msra.mxu0 %v65_v4  ;;  %128 = vmatpush.msra.mxu1 %v65_v4 }
  0x17   :  { %75 = vmatpush.msra.mxu0 %v64_v5  ;;  %129 = vmatpush.msra.mxu1 %v64_v5 }
  0x19   :  { %76 = vmatpush.msra.mxu0 %v63_v6  ;;  %130 = vmatpush.msra.mxu1 %v63_v6 }
  0x1b   :  { %77 = vmatpush.msra.mxu0 %v62_v7  ;;  %131 = vmatpush.msra.mxu1 %v62_v7 }
  0x1d   :  { %78 = vmatpush.msra.mxu0 %v61_v8  ;;  %132 = vmatpush.msra.mxu1 %v61_v8 }
  0x1f   :  { %79 = vmatpush.msra.mxu0 %v60_v9  ;;  %133 = vmatpush.msra.mxu1 %v60_v9 }
  0x21   :  { %80 = vmatpush.msra.mxu0 %v59_v10  ;;  %134 = vmatpush.msra.mxu1 %v59_v10 }
  0x23   :  { %81 = vmatpush.msra.mxu0 %v58_v11  ;;  %135 = vmatpush.msra.mxu1 %v58_v11 }
  0x25   :  { %82 = vmatpush.msra.mxu0 %v57_v12  ;;  %136 = vmatpush.msra.mxu1 %v57_v12 }
  0x27   :  { %83 = vmatpush.msra.mxu0 %v56_v13  ;;  %137 = vmatpush.msra.mxu1 %v56_v13 }
  0x29   :  { %84 = vmatpush.msra.mxu0 %v55_v14  ;;  %138 = vmatpush.msra.mxu1 %v55_v14 }
  0x2b   :  { %85 = vmatpush.msra.mxu0 %v54_v15  ;;  %139 = vmatpush.msra.mxu1 %v54_v15 }
  0x2c   :  { %86 = vmatmul.f32.vlgmr.msra.gmra.mxu0 %v52_v16  ;;  %89 = vmatmul.f32.vlgmr.msra.gmra.mxu1 %v53_v17 }
  0xa9   :  { %v87_v18 = vpop.f32.mrf.mxu0  ;;  %v90_v19 = vpop.f32.mrf.mxu1 }
  0xaa   :  { %102 = vst [vmem:[#allocation8] sm:$0xff] %v87_v18 }
  0xab   :  { %103 = vst [vmem:[#allocation8 + $0x8] sm:$0xff] %v90_v19 }
  0xac   :  { %116 = dma.vmem_to_hbm [thread:$0]  %s109_s1, 256, %s111_s23, [#allocation5], %s224_s17, %s224_s17, %s225_s18  }
  0xad   :  { %221 = dma.done.wait [#allocation5], 256  }
  0xae   :  { %222 = vsyncadd [#allocation5], 4294967040 }
  0xaf   :  { %121 = vsyncpa [#allocation4], 1 }
  0xb0   :  { %122 = vsyncpa [#allocation7], 1 }
  0xb1   :  { %123 = vsyncpa [#allocation5], 1 }

</bundles_post_ra>
